<compile_context>
chip_gen: v5e
topology: v5e:2x2
jax: 0.10.0
libtpu: 0.0.40
codegen_flags: <defaults>
</compile_context>

<pallas_src>
import functools

import numpy as np
import jax
import jax.numpy as jnp
from jax import lax
from jax.experimental import pallas as pl
from jax.experimental.pallas import tpu as pltpu

IGNORE_ID = -1  # same constant used by the reference module


def _vmem_capacity_bytes():
    """Per-TensorCore VMEM capacity; conservative fallback if query fails."""
    try:
        info = pltpu.get_tpu_info()
        cap = getattr(info, "vmem_capacity_bytes", None)
        if cap:
            return int(cap)
    except Exception:
        pass
    return 64 << 20  # v7x per-TC VMEM; safe lower bound for v5e/v6e too


def _concat_kernel(alen_ref, tlen_ref, audio_ref, text_ref, out_ref, scratch_ref,
                   *, ignore_id):
    """One (batch, channel-tile) step: audio[:a_len] then text[:t_len], rest fill."""
    b = pl.program_id(0)

    Ta, tc = audio_ref.shape      # padded audio length bound, channel tile
    Tt, _ = text_ref.shape        # padded text length bound
    To, _ = out_ref.shape         # max combined length
    dtype = out_ref.dtype
    fill = jnp.asarray(ignore_id, dtype=dtype)

    # Clamp so the dynamic-offset store below can never go out of bounds,
    # even with malformed length vectors (OOB VMEM stores are unchecked).
    a_len = jnp.clip(alen_ref[b], 0, Ta)
    t_len = jnp.clip(tlen_ref[b], 0, Tt)

    # 1) Audio prefix (rows < a_len), fill elsewhere.  Rows >= To are never
    #    read back, so only min(Ta, To) rows are written.
    ta_w = min(Ta, To)
    r_a = lax.broadcasted_iota(jnp.int32, (ta_w, 1), 0)
    scratch_ref[0:ta_w, :] = jnp.where(r_a < a_len, audio_ref[0:ta_w, :], fill)

    # 2) Fill rows [Ta, To) so every row < To is initialized before step 3.
    if To > Ta:
        scratch_ref[Ta:To, :] = jnp.full((To - Ta, tc), ignore_id, dtype=dtype)

    # 3) Text block (rows < t_len valid, fill past that) at dynamic row offset
    #    a_len.  Always in bounds: a_len + tt_w <= Ta + Tt <= scratch rows.
    tt_w = min(Tt, To)
    r_t = lax.broadcasted_iota(jnp.int32, (tt_w, 1), 0)
    scratch_ref[pl.ds(a_len, tt_w), :] = jnp.where(
        r_t < t_len, text_ref[0:tt_w, :], fill)

    # 4) Single lane-dense store of the useful prefix only.
    out_ref[...] = scratch_ref[0:To, :]


def concat_pallas(audio, audio_len, text, text_len,
                  audio_first=True, ignore_id=IGNORE_ID, max_combined_len=None):
    """Pallas equivalent of Concat.forward.  Returns (padded, combined_len)."""
    if not audio_first:
        audio, text = text, audio
        audio_len, text_len = text_len, audio_len

    B, Ta, C = audio.shape
    Bt, Tt, Ct = text.shape
    assert C == Ct and B == Bt, "Inconsistency in feature dimension!"

    # Output width = max actual combined length (data-dependent shape, like
    # pad_sequence).  Prefer host-known lengths (numpy / python) or an explicit
    # max_combined_len to avoid a device->host sync; device arrays still work.
    # TODO(synk): fully-traced usage requires passing max_combined_len, since a
    # data-dependent output shape cannot exist under jit.
    if max_combined_len is not None:
        t_out = int(max_combined_len)
    else:
        al_h = (np.asarray(jax.device_get(audio_len))
                if isinstance(audio_len, jax.Array) else np.asarray(audio_len))
        tl_h = (np.asarray(jax.device_get(text_len))
                if isinstance(text_len, jax.Array) else np.asarray(text_len))
        t_out = int(np.max(al_h.astype(np.int64) + tl_h.astype(np.int64)))
    t_out = max(t_out, 1)

    alen = jnp.asarray(audio_len, jnp.int32)
    tlen = jnp.asarray(text_len, jnp.int32)
    comb_len = alen + tlen

    # Lane-dense output stores: pad C up to a multiple of 128, slice back after.
    Cp = C if C % 128 == 0 else ((C + 127) // 128) * 128
    if Cp != C:
        audio = jnp.pad(audio, ((0, 0), (0, 0), (0, Cp - C)))
        text = jnp.pad(text, ((0, 0), (0, 0), (0, Cp - C)))

    dtype = audio.dtype
    itemsize = jnp.dtype(dtype).itemsize
    scratch_rows = max(Ta + Tt, t_out)

    # Per-step VMEM footprint: double-buffered audio/text/out windows + scratch.
    def _footprint(tc_):
        return itemsize * tc_ * (2 * Ta + 2 * Tt + 2 * t_out + scratch_rows)

    cap = _vmem_capacity_bytes()
    budget = cap * 3 // 4
    cands = [t for t in range(Cp, 0, -128) if Cp % t == 0] or [Cp]
    tc = cands[-1]                       # smallest legal tile as last resort
    for t in cands:                      # largest tile that fits the budget
        if _footprint(t) <= budget:
            tc = t
            break

    # v7x has 2 TensorCores/chip: keep >= 2 grid steps when possible so both
    # cores get work and the pipeline has depth.
    if B * (Cp // tc) < 2:
        smaller = [t for t in cands if t < tc]
        if smaller:
            tc = smaller[0]

    grid = (B, Cp // tc)
    vmem_limit = int(min(cap, max(_footprint(tc) * 5 // 4, 32 << 20)))

    kernel = functools.partial(_concat_kernel, ignore_id=ignore_id)

    def _make_call(use_bounded_slice):
        if use_bounded_slice:
            # Only DMA the valid prefix rows (rounded up to 8 sublanes).
            def a_map(b, c, al, tl):
                n = jnp.minimum(jnp.maximum(((al[b] + 7) // 8) * 8, 8), Ta)
                return (b, pl.ds(0, n), c)

            def t_map(b, c, al, tl):
                n = jnp.minimum(jnp.maximum(((tl[b] + 7) // 8) * 8, 8), Tt)
                return (b, pl.ds(0, n), c)

            a_spec = pl.BlockSpec((pl.Squeezed(), pl.BoundedSlice(Ta), tc), a_map)
            t_spec = pl.BlockSpec((pl.Squeezed(), pl.BoundedSlice(Tt), tc), t_map)
        else:
            a_spec = pl.BlockSpec((pl.Squeezed(), Ta, tc),
                                  lambda b, c, al, tl: (b, 0, c))
            t_spec = pl.BlockSpec((pl.Squeezed(), Tt, tc),
                                  lambda b, c, al, tl: (b, 0, c))

        return pl.pallas_call(
            kernel,
            out_shape=jax.ShapeDtypeStruct((B, t_out, Cp), dtype),
            grid_spec=pltpu.PrefetchScalarGridSpec(
                num_scalar_prefetch=2,
                grid=grid,
                in_specs=[a_spec, t_spec],
                out_specs=pl.BlockSpec((pl.Squeezed(), t_out, tc),
                                       lambda b, c, al, tl: (b, 0, c)),
                scratch_shapes=[pltpu.VMEM((scratch_rows, tc), dtype)],
            ),
            compiler_params=pltpu.CompilerParams(
                dimension_semantics=("parallel", "parallel"),
                vmem_limit_bytes=vmem_limit),
        )

    try:
        if not hasattr(pl, "BoundedSlice"):
            raise AttributeError("pl.BoundedSlice unavailable")
        out = _make_call(True)(alen, tlen, audio, text)
        out = jax.block_until_ready(out)
    except Exception:
        # Fallback: full-prefix (static) input windows; identical semantics.
        out = _make_call(False)(alen, tlen, audio, text)

    if Cp != C:
        out = out[..., :C]
    return out, comb_len


def _reference(first, flen, second, slen, ignore_id=IGNORE_ID):
    first, second = np.asarray(first), np.asarray(second)
    flen, slen = np.asarray(flen), np.asarray(slen)
    B, _, C = first.shape
    comb = (flen + slen).astype(np.int32)
    t_out = int(comb.max())
    out = np.full((B, t_out, C), ignore_id, dtype=first.dtype)
    for b in range(B):
        a, t = int(flen[b]), int(slen[b])
        out[b, :a] = first[b, :a]
        out[b, a:a + t] = second[b, :t]
    return out, comb


if __name__ == "__main__":
    key = jax.random.PRNGKey(0)
    k1, k2 = jax.random.split(key)

    B, Ta, Tt, C = 2, 16, 8, 128
    audio = jax.random.normal(k1, (B, Ta, C), dtype=jnp.float32)
    text = jax.random.normal(k2, (B, Tt, C), dtype=jnp.float32)
    audio_len = np.array([10, 7], dtype=np.int32)   # numpy lengths: no host sync
    text_len = np.array([5, 8], dtype=np.int32)

    # 1) audio_first=True  (combined max < Ta: exercises To <= Ta path)
    out, out_len = concat_pallas(audio, audio_len, text, text_len,
                                 audio_first=True, ignore_id=IGNORE_ID)
    out = jax.block_until_ready(out)
    out_len = jax.block_until_ready(out_len)
    ref_out, ref_len = _reference(audio, audio_len, text, text_len, IGNORE_ID)
    assert out.shape == ref_out.shape, (out.shape, ref_out.shape)
    np.testing.assert_allclose(np.asarray(out), ref_out, rtol=0, atol=0)
    np.testing.assert_array_equal(np.asarray(out_len), ref_len)

    # 2) audio_first=False (text goes first)
    out2, out_len2 = concat_pallas(audio, audio_len, text, text_len,
                                   audio_first=False, ignore_id=IGNORE_ID)
    out2 = jax.block_until_ready(out2)
    out_len2 = jax.block_until_ready(out_len2)
    ref_out2, ref_len2 = _reference(text, text_len, audio, audio_len, IGNORE_ID)
    assert out2.shape == ref_out2.shape, (out2.shape, ref_out2.shape)
    np.testing.assert_allclose(np.asarray(out2), ref_out2, rtol=0, atol=0)
    np.testing.assert_array_equal(np.asarray(out_len2), ref_len2)

    # 3) non-128 channels + combined max > Ta (exercises C-padding + tail fill)
    k3, k4 = jax.random.split(k2)
    audio3 = jax.random.normal(k3, (2, 8, 96), dtype=jnp.float32)
    text3 = jax.random.normal(k4, (2, 8, 96), dtype=jnp.float32)
    alen3 = np.array([8, 6], dtype=np.int32)
    tlen3 = np.array([8, 3], dtype=np.int32)
    out3, out_len3 = concat_pallas(audio3, alen3, text3, tlen3,
                                   audio_first=True, ignore_id=IGNORE_ID)
    out3 = jax.block_until_ready(out3)
    out_len3 = jax.block_until_ready(out_len3)
    ref_out3, ref_len3 = _reference(audio3, alen3, text3, tlen3, IGNORE_ID)
    assert out3.shape == ref_out3.shape, (out3.shape, ref_out3.shape)
    np.testing.assert_allclose(np.asarray(out3), ref_out3, rtol=0, atol=0)
    np.testing.assert_array_equal(np.asarray(out_len3), ref_len3)

    print("KERNEL_OK")
</pallas_src>

<mosaic_0001>
module attributes {stable_mosaic.version = 11 : i64} {
  func.func @_concat_kernel(%arg0: i32, %arg1: i32, %arg2: memref<2xi32, #tpu.memory_space<smem>>, %arg3: memref<2xi32, #tpu.memory_space<smem>>, %arg4: memref<1x16x128xf32, #tpu.memory_space<vmem>>, %arg5: memref<1x8x128xf32, #tpu.memory_space<vmem>>, %arg6: memref<1x15x128xf32, #tpu.memory_space<vmem>>, %arg7: memref<24x128xf32, #tpu.memory_space<vmem>>) attributes {dimension_semantics = [#tpu.dimension_semantics<parallel>, #tpu.dimension_semantics<parallel>], iteration_bounds = array<i64: 2, 1>, scalar_prefetch = 2 : i64, scratch_operands = 1 : i64, tpu.core_type = #tpu.core_type<tc>, window_params = [{transform_indices = @transform_0, window_bounds = array<i64: 1, 16, 128>}, {transform_indices = @transform_1, window_bounds = array<i64: 1, 8, 128>}, {transform_indices = @transform_2, window_bounds = array<i64: 1, 15, 128>}]} {
    %0 = arith.index_cast %arg0 : i32 to index
    %1 = memref.load %arg2[%0] : memref<2xi32, #tpu.memory_space<smem>>
    %c0_i32 = arith.constant 0 : i32
    %c16_i32 = arith.constant 16 : i32
    %2 = arith.maxsi %c0_i32, %1 : i32
    %3 = arith.minsi %c16_i32, %2 : i32
    %4 = arith.index_cast %arg0 : i32 to index
    %5 = memref.load %arg3[%4] : memref<2xi32, #tpu.memory_space<smem>>
    %c0_i32_0 = arith.constant 0 : i32
    %c8_i32 = arith.constant 8 : i32
    %6 = arith.maxsi %c0_i32_0, %5 : i32
    %7 = arith.minsi %c8_i32, %6 : i32
    %8 = tpu.iota {dimensions = array<i32: 0>} : vector<15x1xi32>
    %9 = vector.broadcast %3 : i32 to vector<15x1xi32>
    %10 = arith.cmpi slt, %8, %9 : vector<15x1xi32>
    %c0 = arith.constant 0 : index
    %c0_1 = arith.constant 0 : index
    %c0_2 = arith.constant 0 : index
    %11 = vector.load %arg4[%c0, %c0_1, %c0_2] : memref<1x16x128xf32, #tpu.memory_space<vmem>>, vector<1x15x128xf32>
    %12 = vector.shape_cast %11 : vector<1x15x128xf32> to vector<15x128xf32>
    %cst = arith.constant -1.000000e+00 : f32
    %13 = vector.shape_cast %10 : vector<15x1xi1> to vector<15x1xi1>
    %14 = vector.broadcast %13 : vector<15x1xi1> to vector<15x128xi1>
    %15 = vector.broadcast %cst : f32 to vector<15x128xf32>
    %16 = arith.select %14, %12, %15 : vector<15x128xi1>, vector<15x128xf32>
    %c0_3 = arith.constant 0 : index
    %c0_4 = arith.constant 0 : index
    %17 = vector.load %arg7[%c0_3, %c0_4] : memref<24x128xf32, #tpu.memory_space<vmem>>, vector<15x128xf32>
    tpu.vector_store %arg7[%c0_3, %c0_4], %16 {strides = array<i32>} : memref<24x128xf32, #tpu.memory_space<vmem>>, vector<15x128xf32>,
    %18 = tpu.iota {dimensions = array<i32: 0>} : vector<8x1xi32>
    %19 = vector.broadcast %7 : i32 to vector<8x1xi32>
    %20 = arith.cmpi slt, %18, %19 : vector<8x1xi32>
    %c0_5 = arith.constant 0 : index
    %c0_6 = arith.constant 0 : index
    %c0_7 = arith.constant 0 : index
    %21 = vector.load %arg5[%c0_5, %c0_6, %c0_7] : memref<1x8x128xf32, #tpu.memory_space<vmem>>, vector<1x8x128xf32>
    %22 = vector.shape_cast %21 : vector<1x8x128xf32> to vector<8x128xf32>
    %cst_8 = arith.constant -1.000000e+00 : f32
    %23 = vector.shape_cast %20 : vector<8x1xi1> to vector<8x1xi1>
    %24 = vector.broadcast %23 : vector<8x1xi1> to vector<8x128xi1>
    %25 = vector.broadcast %cst_8 : f32 to vector<8x128xf32>
    %26 = arith.select %24, %22, %25 : vector<8x128xi1>, vector<8x128xf32>
    %27 = arith.index_cast %3 : i32 to index
    %c0_9 = arith.constant 0 : index
    %28 = vector.load %arg7[%27, %c0_9] : memref<24x128xf32, #tpu.memory_space<vmem>>, vector<8x128xf32>
    tpu.vector_store %arg7[%27, %c0_9], %26 {strides = array<i32>} : memref<24x128xf32, #tpu.memory_space<vmem>>, vector<8x128xf32>,
    %c0_10 = arith.constant 0 : index
    %c0_11 = arith.constant 0 : index
    %29 = vector.load %arg7[%c0_10, %c0_11] : memref<24x128xf32, #tpu.memory_space<vmem>>, vector<15x128xf32>
    %c0_12 = arith.constant 0 : index
    %c0_13 = arith.constant 0 : index
    %c0_14 = arith.constant 0 : index
    %30 = vector.load %arg6[%c0_12, %c0_13, %c0_14] : memref<1x15x128xf32, #tpu.memory_space<vmem>>, vector<1x15x128xf32>
    %31 = vector.shape_cast %30 : vector<1x15x128xf32> to vector<15x128xf32>
    %32 = vector.shape_cast %29 : vector<15x128xf32> to vector<1x15x128xf32>
    tpu.vector_store %arg6[%c0_12, %c0_13, %c0_14], %32 {strides = array<i32>} : memref<1x15x128xf32, #tpu.memory_space<vmem>>, vector<1x15x128xf32>,
    return
  }
  func.func @transform_0(%arg0: i32, %arg1: i32, %arg2: memref<2xi32, #tpu.memory_space<smem>>, %arg3: memref<2xi32, #tpu.memory_space<smem>>) -> (i32, i32, i32) {
    %c0_i32 = arith.constant 0 : i32
    %c0_i32_0 = arith.constant 0 : i32
    return %arg0, %c0_i32, %arg1 : i32, i32, i32
  }
  func.func @transform_1(%arg0: i32, %arg1: i32, %arg2: memref<2xi32, #tpu.memory_space<smem>>, %arg3: memref<2xi32, #tpu.memory_space<smem>>) -> (i32, i32, i32) {
    %c0_i32 = arith.constant 0 : i32
    %c0_i32_0 = arith.constant 0 : i32
    return %arg0, %c0_i32, %arg1 : i32, i32, i32
  }
  func.func @transform_2(%arg0: i32, %arg1: i32, %arg2: memref<2xi32, #tpu.memory_space<smem>>, %arg3: memref<2xi32, #tpu.memory_space<smem>>) -> (i32, i32, i32) {
    %c0_i32 = arith.constant 0 : i32
    %c0_i32_0 = arith.constant 0 : i32
    return %arg0, %c0_i32, %arg1 : i32, i32, i32
  }
}

</mosaic_0001>

<bundles_post_ra>
// kernel: tpu_custom_call.1
= control target key start
LH: loop header
LB: loop body
LE: loop exit
PB: predicated region body
PF: predicated region fallthrough
CT: control target
= control target key end

     0   :  { %s638_s21 = smov [#allocation4]   ;;  %s639_s22 = smov [#allocation5]   ;;  %s781_s0 = inlined_call_operand.hbm [shape: s32[2], index: 0, kind: input, shape index: {}]   ;;  %s782_s2 = inlined_call_operand.hbm [shape: f32[2,16,128], index: 2, kind: input, shape index: {}]   ;;  %s783_s3 = inlined_call_operand.hbm [shape: f32[2,8,128], index: 3, kind: input, shape index: {}]   ;;  %s784_s4 = inlined_call_operand.vmem [shape: f32[2,15,128], index: 4, kind: output, shape index: {}]   ;;  %s785_s1 = inlined_call_operand.hbm [shape: s32[2], index: 1, kind: input, shape index: {}]  }
   0x1   :  { %s10_s17 = sshll.u32 %s781_s0, 4  ;;  %s15_s20 = sshll.u32 %s785_s1, 4  ;;  %s11_s17 = int_to_ptr.hbm [resolvable:$true] %s10_s17  ;;  %s16_s20 = int_to_ptr.hbm [resolvable:$true] %s15_s20 }
   0x2   :  { %13 = dma.hbm_to_smem %s11_s17, 16, %s638_s21, [#allocation3] }
   0x3   :  { %18 = dma.hbm_to_smem %s16_s20, 16, %s639_s22, [#allocation3] }
   0x4   :  { %604 = dma.done.wait [#allocation3], 32 }
   0x5   :  { %605 = vsyncadd [#allocation3], 4294967264 }
   0x6   :  { %21 = sfence }
   0x7   :  { %22 = vsyncpa [#allocation7], 0 }
   0x8   :  { %24 = vsyncpa [#allocation7 + $0x1], 0 }
   0x9   :  { %25 = vsyncpa [#allocation9], 0 }
   0xa   :  { %27 = vsyncpa [#allocation9 + $0x1], 0  ;;  %s673_s23 = smov 0   ;;  %s675_s0 = smov 0  }
   0xb   :  { %s677_s24 = smov 0   ;;  %s679_s1 = smov 0  }
   0xc   :  { %s681_s25 = smov 0   ;;  %s683_s26 = smov 0  }
   0xd LB: > { %s400_s27 = sadd.s32 4294967295, %s636_s26   ;;  %s45_s28 = sadd.s32 1, %s632_s25  ;;  %s636_s26 = sphi %s683_s26, %s33_s26   ;;  %s632_s25 = sphi %s681_s25, %s793_s25   ;;  %s628_s1 = sphi %s679_s1, %s792_s1   ;;  %s624_s24 = sphi %s677_s24, %s791_s24   ;;  %s620_s0 = sphi %s675_s0, %s790_s0   ;;  %s616_s23 = sphi %s673_s23, %s789_s23  }
   0xe   : > { %p47_p0 = scmp.ge.s32.totalorder %s45_s28, 2  ;;  %s54_s29 = sadd.s32 1, %s624_s24 }
   0xf   : > { %p61_p1 = scmp.ne.s32.totalorder %s624_s24, %s620_s0  ;;  %p62_p2 = scmp.eq.s32.totalorder %s636_s26, 0 }
  0x10   : > { %s795_s28 = smov (%p47_p0, %s45_s28), 0  ;;  %p67_p4 = scmp.ne.s32.totalorder %s620_s0, %s616_s23 }
  0x11   : > { %p709_p3 = por %p62_p2, %p61_p1  ;;  %s49_s5 = ssub.s32 %s632_s25, %s795_s28 }
  0x12   : > { %p68_p5 = scmp.eq.s32.totalorder %s400_s27, 0  ;;  %p52_p6 = scmp.eq.s32.totalorder %s49_s5, 0 }
  0x13   : > { %p443_p8 = scmp.lt.s32.totalorder %s636_s26, 2  ;;  %s147_s8 = sand.u32 1, %s624_s24  }
  0x14   : > { %p716_p7 = por %p68_p5, %p67_p4  ;;  %s426_s9 = sshll.u32 %s632_s25, 4 }
  0x15   : > { %s722_s7 = scalar_select %p52_p6, %s624_s24, %s54_s29  }
  0x16   : > { %s404_s10 = sshll.u32 %s147_s8, 4  ;;  %s157_s13 = scalar_lea.hbm %s782_s2, %s426_s9 }
  0x17   : > { %s158_s14 = sshll.u32 %s157_s13, 4  ;;  %s151_s15 = scalar_lea.vmem [#allocation6], %s404_s10  ;;  %s159_s14 = int_to_ptr.hbm [resolvable:$true] %s158_s14 }
  0x18   : > { %s160_s16 = sshll.u32 %s151_s15, 4  ;;  %p731_p9 = pnand %p443_p8, %p709_p3  ;;  %s161_s16 = int_to_ptr.vmem [resolvable:$true] %s160_s16 }
  0x19   : > { %p409_p10 = scmp.ge.s32.totalorder %s636_s26, 1  ;;  %p188_p11 = scmp.lt.s32.totalorder %s636_s26, 3 }
  0x1a   : > { %s148_s18 = scalar_lea.sflag [#allocation7], %s147_s8  ;;  %s640_s19 = smov 128  }
  0x1b   : > { %s641_s20 = smov 8   ;;  %p189_p12 = pnand %p409_p10, %p188_p11 }
  0x1c   : > { %439 = dma.hbm_to_vmem [thread:$0]  (!%p731_p9), %s159_s14, 256, %s161_s16, %s148_s18, %s640_s19, %s640_s19, %s641_s20  }
  0x1d   : > { %s407_s21 = sshll.u32 %s147_s8, 3  ;;  %s408_s22 = sshll.u32 %s632_s25, 3 }
  0x1e   : > { %s179_s29 = scalar_lea.hbm %s783_s3, %s408_s22  ;;  %s174_s5 = scalar_lea.vmem [#allocation8], %s407_s21 }
  0x1f   : > { %s181_s30 = sshll.u32 %s179_s29, 4  ;;  %s183_s9 = sshll.u32 %s174_s5, 4  ;;  %s182_s30 = int_to_ptr.hbm [resolvable:$true] %s181_s30  ;;  %s184_s9 = int_to_ptr.vmem [resolvable:$true] %s183_s9 }
  0x20   : > { %s171_s10 = scalar_lea.sflag [#allocation9], %s147_s8  ;;  %192 = sbr.rel (%p189_p12) target bundleno = 66 (0x42), region = 28 }
  0x21   : > { %442 = dma.hbm_to_vmem [thread:$0]  (!%p731_p9), %s182_s30, 128, %s184_s9, %s171_s10  }
  0x22   : > { %s194_s11 = sand.u32 (!%p189_p12), 1, %s620_s0  }
  0x23   : > { %s410_s12 = sshll.u32 (!%p189_p12), %s194_s11, 4  ;;  %s195_s13 = scalar_lea.sflag (!%p189_p12), [#allocation7], %s194_s11 }
  0x24   : > { %s198_s14 = scalar_lea.vmem (!%p189_p12), [#allocation6], %s410_s12 }
  0x25   : > { %607 = dma.done.wait (%p716_p7), %s195_s13, 256  }
  0x26   : > { %609 = vsyncadd (%p716_p7), %s195_s13, 4294967040  ;;  %s411_s15 = sshll.u32 %s194_s11, 3  ;;  %s205_s16 = scalar_lea.sflag [#allocation9], %s194_s11 }
  0x27   : > { %s208_s18 = scalar_lea.vmem [#allocation8], %s411_s15 }
  0x28   : > { %611 = dma.done.wait (%p716_p7), %s205_s16, 128  }
  0x29   : > { %613 = vsyncadd (%p716_p7), %s205_s16, 4294967168  ;;  %s246_s8 = sld [smem:[#allocation4 + %s628_s1]]  ;;  %v256_v0 = vlaneseq  ;;  %p238_p13 = scmp.lt.s32.totalorder %s628_s1, 1  ;;  %v262_v3 = vld [vmem:[%s198_s14] sm:$0xff]  ;;  %v263_v4 = vld [vmem:[%s198_s14 + $0x8] sm:$0x7f] }
  0x2a   : > { %s251_s17 = sld [smem:[#allocation5 + %s628_s1]]  ;;  %v274_v6 = vld [vmem:[%s208_s18] sm:$0xff] }
  0x2b   : > { %v257_v1 = vshrl.u32 %v256_v0, 7  ;;  %s805_s1 = smov (!%p238_p13, %s628_s1), 1 }
  0x2c   : > { %s427_s19 = sshll.u32 %s805_s1, 4 }
  0x2d   : > { %v258_v2 = vadd.s32 8, %v257_v1  ;;  %s245_s22 = scalar_lea.vmem %s784_s4, %s427_s19 }
  0x2f   : > { %p247_p0 = scmp.gt.s32.totalorder %s246_s8, 0  ;;  %p414_p1 = scmp.lt.s32.totalorder %s246_s8, 16 }
  0x30   : > { %p252_p2 = scmp.gt.s32.totalorder %s251_s17, 0  ;;  %p419_p3 = scmp.lt.s32.totalorder %s251_s17, 8 }
  0x31   : > { %s797_s8 = smov (!%p247_p0, %s246_s8), 0 }
  0x32   : > { %s799_s17 = smov (!%p252_p2, %s251_s17), 0  ;;  %s801_s8 = smov (!%p414_p1, %s797_s8), 16 }
  0x33   : > { %s803_s17 = smov (!%p419_p3, %s799_s17), 8  ;;  %v259_v5 = vstv %s801_s8  ;;  %s278_s6 = scalar_lea.vmem [#allocation2], %s801_s8 }
  0x34   : > { %vm260_vm0 = vcmp.lt.s32.totalorder %v257_v1, %v259_v5  ;;  %vm261_vm1 = vcmp.lt.s32.totalorder %v258_v2, %v259_v5  ;;  %v272_v7 = vstv %s803_s17 }
  0x35   : > { %v268_v8 = vsel %vm260_vm0, %v262_v3, -1.0  ;;  %v269_v9 = vsel %vm261_vm1, %v263_v4, -1.0  ;;  %vm273_vm2 = vcmp.lt.s32.totalorder %v257_v1, %v272_v7 }
  0x36   : > { %270 = vst [vmem:[#allocation2] sm:$0xff] %v268_v8  ;;  %v277_v10 = vsel %vm273_vm2, %v274_v6, -1.0 }
  0x37   : > { %271 = vst [vmem:[#allocation2 + $0x8] sm:$0x7f] %v269_v9 }
  0x38   : > { %279 = vst [vmem:[%s278_s6] sm:$0xff] %v277_v10 }
  0x3f   : > { %v280_v11 = vld [vmem:[#allocation2] sm:$0xff]  ;;  %v281_v12 = vld [vmem:[#allocation2 + $0x8] sm:$0x7f] }
  0x40   : > { %282 = vst [vmem:[%s245_s22] sm:$0xff] %v280_v11 }
  0x41   : > { %283 = vst [vmem:[%s245_s22 + $0x8] sm:$0x7f] %v281_v12 }
  0x42 PF: > { %s33_s26 = sadd.s32 1, %s636_s26   ;;  %s789_s23 = smov %s620_s0 }
  0x43   : > { %p30_p4 = scmp.ge.s32.totalorder %s33_s26, 4   ;;  %s790_s0 = smov %s624_s24 }
  0x44   : > { %s791_s24 = smov %s722_s7  ;;  %s792_s1 = smov %s632_s25 }
  0x45   : > { %s793_s25 = smov %s795_s28  ;;  %32 = sbr.rel (!%p30_p4) target bundleno = 13 (0xd), region = 82 }
  0x4a   :  { %311 = vsyncpa [#allocation7], 1 }
  0x4b   :  { %313 = vsyncpa [#allocation7 + $0x1], 1 }
  0x4c   :  { %314 = vsyncpa [#allocation9], 1 }
  0x4d   :  { %316 = vsyncpa [#allocation9 + $0x1], 1 }

</bundles_post_ra>
